<compile_context>
chip_gen: v7x
topology: tpu7x:2x2x1
jax: 0.10.0
libtpu: 0.0.40
codegen_flags: <defaults>
</compile_context>

<pallas_src>
import functools

import jax
import jax.numpy as jnp
from jax.experimental import pallas as pl
from jax.experimental.pallas import tpu as pltpu


def _round_up(x, m):
    return ((x + m - 1) // m) * m


def _critic_kernel(num_hidden, *refs):
    # refs layout:
    #   x_ref      (TB, D) bf16          streamed activation tile
    #   labels_ref (TB, 1) int32         streamed label tile
    #   (w_i, b_i) * num_hidden          hidden Linear (+ReLU); W:(in,out) bf16, b:(1,out) f32
    #   table_ref  (num_classes, H) f32  Emb + wf_row (final weight folded in)
    #   bf_ref     (1, 1) f32 in SMEM    final Linear bias
    #   out_ref    (TB, 1) f32
    x_ref = refs[0]
    labels_ref = refs[1]
    hidden_refs = refs[2:2 + 2 * num_hidden]
    table_ref = refs[2 + 2 * num_hidden]
    bf_ref = refs[3 + 2 * num_hidden]
    out_ref = refs[4 + 2 * num_hidden]

    y = x_ref[...]  # (TB, D) bf16: feeds the first MXU op directly
    for i in range(num_hidden):
        w_ref = hidden_refs[2 * i]
        b_ref = hidden_refs[2 * i + 1]
        acc = jnp.dot(y.astype(w_ref.dtype), w_ref[...],
                      preferred_element_type=jnp.float32)
        y = jnp.maximum(acc + b_ref[...], 0.0)  # bias add / ReLU in f32

    # Combined projection + final-layer weights: gather row labels[i] of the
    # f32 (num_classes, H) table via a tiny one-hot matmul (num_classes small).
    # NOTE: out-of-range labels silently give a zero row (unlike torch Embedding).
    labels = labels_ref[...]                      # (TB, 1) int32
    tb = labels.shape[0]
    num_classes = table_ref.shape[0]
    onehot = (
        jax.lax.broadcasted_iota(jnp.int32, (tb, num_classes), 1) == labels
    ).astype(jnp.float32)
    w_comb = jnp.dot(onehot, table_ref[...],
                     preferred_element_type=jnp.float32)  # (TB, H) f32

    # Folded final layer: y @ wf^T + bf + sum(Emb[l]*y) == sum(y*(Emb[l]+wf)) + bf
    out = jnp.sum(y * w_comb, axis=1, keepdims=True) + bf_ref[0, 0]
    out_ref[...] = out.astype(out_ref.dtype)


def conditional_critic_forward(data, labels, params, *, block_batch=4096):
    """ConditionalCritic forward.

    data:   (B, x_input) float
    labels: (B,) int
    params: dict with
      'hidden': list of (W, b), W: (in, out) bf16, b: (1, out) f32
      'final' : (wf_row, bf), wf_row: (1, hidden_last) f32, bf: (1, 1) f32
      'embed' : (num_classes, hidden_last) bf16
    Returns (B, 1) float32.
    """
    num_hidden = len(params["hidden"])
    batch, x_dim = data.shape

    # Grid shaping: target <= 2 steps (dual-TC sharding on v7x via "parallel";
    # near-minimal step overhead on single-TC v5e/v6e), tb capped at
    # block_batch rows and 16-row aligned (bf16 sublane packing).
    half = _round_up(pl.cdiv(batch, 2), 16)
    tb = max(16, min(_round_up(block_batch, 16), half))
    b_pad = _round_up(batch, tb)

    # Cast activations to bf16 once here: halves the only streamed DMA and
    # removes the in-kernel f32->bf16 cast of the first layer input.
    data = data.astype(jnp.bfloat16)
    if b_pad != batch:
        data = jnp.pad(data, ((0, b_pad - batch), (0, 0)))
        labels = jnp.pad(labels, (0, b_pad - batch))
    labels2d = labels.reshape(b_pad, 1).astype(jnp.int32)

    wf_row, bf = params["final"]
    emb = params["embed"]
    # Fold the width-1 final Linear's weight row into the embedding table.
    table = emb.astype(jnp.float32) + wf_row.astype(jnp.float32)  # (C, H) f32

    tile_map = lambda i: (i, 0)   # streams with the batch grid
    const_map = lambda i: (0, 0)  # stays VMEM-resident across all grid steps

    inputs = [data, labels2d]
    in_specs = [
        pl.BlockSpec((tb, x_dim), tile_map),
        pl.BlockSpec((tb, 1), tile_map),
    ]
    for w, b in params["hidden"]:
        inputs += [w, b]
        in_specs += [pl.BlockSpec(w.shape, const_map),
                     pl.BlockSpec(b.shape, const_map)]
    inputs += [table, bf]
    in_specs += [
        pl.BlockSpec(table.shape, const_map),
        pl.BlockSpec(memory_space=pltpu.MemorySpace.SMEM),  # scalar final bias
    ]

    # Advisory cost estimate so XLA can schedule around this few-us call.
    flops = 0
    weight_bytes = 0
    for w, b in params["hidden"]:
        flops += 2 * b_pad * w.shape[0] * w.shape[1]
        weight_bytes += w.size * w.dtype.itemsize + b.size * b.dtype.itemsize
    flops += 2 * b_pad * table.shape[0] * table.shape[1]   # one-hot gather
    flops += 2 * b_pad * table.shape[1]                    # folded final reduction
    weight_bytes += table.size * 4 + bf.size * 4
    bytes_accessed = (b_pad * x_dim * 2       # bf16 activations in
                      + b_pad * 4             # int32 labels in
                      + weight_bytes          # resident weights / table
                      + b_pad * 4)            # f32 output
    cost = pl.CostEstimate(flops=flops, transcendentals=0,
                           bytes_accessed=bytes_accessed)

    kernel = functools.partial(_critic_kernel, num_hidden)
    out = pl.pallas_call(
        kernel,
        out_shape=jax.ShapeDtypeStruct((b_pad, 1), jnp.float32),
        grid=(b_pad // tb,),
        in_specs=in_specs,
        out_specs=pl.BlockSpec((tb, 1), tile_map),
        compiler_params=pltpu.CompilerParams(
            dimension_semantics=("parallel",)),
        cost_estimate=cost,
    )(*inputs)
    return out[:batch]


def init_params(key, x_input, critic_layers, num_classes, *,
                matmul_dtype=jnp.bfloat16):
    """Deterministic init mirroring the PyTorch module's __init__ semantics."""
    params = {"hidden": [], "final": None, "embed": None}
    in_dim = x_input
    for out_dim in critic_layers:
        key, kw = jax.random.split(key)
        # kaiming_normal_(fan_in, relu): std = sqrt(2 / fan_in); bias zero
        std = (2.0 / in_dim) ** 0.5
        w = (std * jax.random.normal(kw, (in_dim, out_dim), dtype=jnp.float32)
             ).astype(matmul_dtype)
        b = jnp.zeros((1, out_dim), dtype=jnp.float32)
        params["hidden"].append((w, b))
        in_dim = out_dim

    # Final layer: xavier_uniform_ on weight of shape (1, in_dim); bias zero.
    # Kept in row layout so it folds into the projection table (never hits MXU).
    key, kw = jax.random.split(key)
    limit = (6.0 / (in_dim + 1)) ** 0.5
    wf_row = jax.random.uniform(kw, (1, in_dim), minval=-limit, maxval=limit,
                                dtype=jnp.float32)
    bf = jnp.zeros((1, 1), dtype=jnp.float32)
    params["final"] = (wf_row, bf)

    # Embedding(num_classes, in_dim) with xavier_uniform_.
    key, ke = jax.random.split(key)
    limit_e = (6.0 / (num_classes + in_dim)) ** 0.5
    emb = jax.random.uniform(ke, (num_classes, in_dim), minval=-limit_e,
                             maxval=limit_e, dtype=jnp.float32
                             ).astype(matmul_dtype)
    params["embed"] = emb
    return params


def reference_forward(data, labels, params):
    """Pure-JAX reference (same dtype casting pattern) for correctness check."""
    y = data
    for w, b in params["hidden"]:
        y = jnp.maximum(
            jnp.dot(y.astype(w.dtype), w, preferred_element_type=jnp.float32) + b,
            0.0)
    wf_row, bf = params["final"]
    proj = params["embed"][labels].astype(jnp.float32)
    out = y @ wf_row.astype(jnp.float32).T + bf
    out = out + jnp.sum(proj * y, axis=1, keepdims=True)
    return out


if __name__ == "__main__":
    # Gene-expression-like shapes; batch large enough to exercise a 2-step grid.
    batch = 512
    x_input = 32
    critic_layers = [64, 32]
    num_classes = 6

    key = jax.random.PRNGKey(0)
    key, kd, kl, kp = jax.random.split(key, 4)

    data = jax.random.normal(kd, (batch, x_input), dtype=jnp.float32)
    labels = jax.random.randint(kl, (batch,), 0, num_classes, dtype=jnp.int32)
    params = init_params(kp, x_input, critic_layers, num_classes)

    out = jax.block_until_ready(
        conditional_critic_forward(data, labels, params))

    ref = reference_forward(data, labels, params)
    assert out.shape == (batch, 1)
    assert jnp.allclose(out, ref, atol=2e-3, rtol=2e-3), (out, ref)

    print("KERNEL_OK")
</pallas_src>

<mosaic_0001>
module attributes {stable_mosaic.version = 11 : i64} {
  func.func @_critic_kernel(%arg0: i32, %arg1: memref<256x32xbf16, #tpu.memory_space<vmem>>, %arg2: memref<256x1xi32, #tpu.memory_space<vmem>>, %arg3: memref<32x64xbf16, #tpu.memory_space<vmem>>, %arg4: memref<1x64xf32, #tpu.memory_space<vmem>>, %arg5: memref<64x32xbf16, #tpu.memory_space<vmem>>, %arg6: memref<1x32xf32, #tpu.memory_space<vmem>>, %arg7: memref<6x32xf32, #tpu.memory_space<vmem>>, %arg8: memref<1x1xf32, #tpu.memory_space<smem>>, %arg9: memref<256x1xf32, #tpu.memory_space<vmem>>) attributes {dimension_semantics = [#tpu.dimension_semantics<parallel>], iteration_bounds = array<i64: 2>, scalar_prefetch = 0 : i64, scratch_operands = 0 : i64, tpu.core_type = #tpu.core_type<tc>, window_params = [{transform_indices = @transform_0, window_bounds = array<i64: 256, 32>}, {transform_indices = @transform_1, window_bounds = array<i64: 256, 1>}, {pipeline_mode = #tpu.pipeline_mode<synchronous>, transform_indices = @transform_2, window_bounds = array<i64: 32, 64>}, {pipeline_mode = #tpu.pipeline_mode<synchronous>, transform_indices = @transform_3, window_bounds = array<i64: 1, 64>}, {pipeline_mode = #tpu.pipeline_mode<synchronous>, transform_indices = @transform_4, window_bounds = array<i64: 64, 32>}, {pipeline_mode = #tpu.pipeline_mode<synchronous>, transform_indices = @transform_5, window_bounds = array<i64: 1, 32>}, {pipeline_mode = #tpu.pipeline_mode<synchronous>, transform_indices = @transform_6, window_bounds = array<i64: 6, 32>}, {transform_indices = @transform_7, window_bounds = array<i64: 1, 1>}, {transform_indices = @transform_8, window_bounds = array<i64: 256, 1>}]} {
    %c0 = arith.constant 0 : index
    %c0_0 = arith.constant 0 : index
    %0 = vector.load %arg1[%c0, %c0_0] : memref<256x32xbf16, #tpu.memory_space<vmem>>, vector<256x32xbf16>
    %c0_1 = arith.constant 0 : index
    %c0_2 = arith.constant 0 : index
    %1 = vector.load %arg3[%c0_1, %c0_2] : memref<32x64xbf16, #tpu.memory_space<vmem>>, vector<32x64xbf16>
    %cst = arith.constant dense<0.000000e+00> : vector<256x64xf32>
    %2 = tpu.matmul %0, %1, %cst {dimension_numbers = #tpu.dot_dimension_numbers<[1], [0], [0], [1], [0, 0, 1, 1], [], []>} : vector<256x32xbf16>, vector<32x64xbf16>, vector<256x64xf32> -> vector<256x64xf32>
    %c0_3 = arith.constant 0 : index
    %c0_4 = arith.constant 0 : index
    %3 = vector.load %arg4[%c0_3, %c0_4] : memref<1x64xf32, #tpu.memory_space<vmem>>, vector<1x64xf32>
    %4 = vector.broadcast %3 : vector<1x64xf32> to vector<256x64xf32>
    %5 = arith.addf %2, %4 : vector<256x64xf32>
    %cst_5 = arith.constant 0.000000e+00 : f32
    %6 = vector.broadcast %cst_5 : f32 to vector<256x64xf32>
    %7 = arith.maximumf %5, %6 : vector<256x64xf32>
    %8 = arith.truncf %7 : vector<256x64xf32> to vector<256x64xbf16>
    %c0_6 = arith.constant 0 : index
    %c0_7 = arith.constant 0 : index
    %9 = vector.load %arg5[%c0_6, %c0_7] : memref<64x32xbf16, #tpu.memory_space<vmem>>, vector<64x32xbf16>
    %cst_8 = arith.constant dense<0.000000e+00> : vector<256x32xf32>
    %10 = tpu.matmul %8, %9, %cst_8 {dimension_numbers = #tpu.dot_dimension_numbers<[1], [0], [0], [1], [0, 0, 1, 1], [], []>} : vector<256x64xbf16>, vector<64x32xbf16>, vector<256x32xf32> -> vector<256x32xf32>
    %c0_9 = arith.constant 0 : index
    %c0_10 = arith.constant 0 : index
    %11 = vector.load %arg6[%c0_9, %c0_10] : memref<1x32xf32, #tpu.memory_space<vmem>>, vector<1x32xf32>
    %12 = vector.broadcast %11 : vector<1x32xf32> to vector<256x32xf32>
    %13 = arith.addf %10, %12 : vector<256x32xf32>
    %cst_11 = arith.constant 0.000000e+00 : f32
    %14 = vector.broadcast %cst_11 : f32 to vector<256x32xf32>
    %15 = arith.maximumf %13, %14 : vector<256x32xf32>
    %c0_12 = arith.constant 0 : index
    %c0_13 = arith.constant 0 : index
    %16 = vector.load %arg2[%c0_12, %c0_13] : memref<256x1xi32, #tpu.memory_space<vmem>>, vector<256x1xi32>
    %17 = tpu.iota {dimensions = array<i32: 1>} : vector<256x6xi32>
    %18 = vector.broadcast %16 : vector<256x1xi32> to vector<256x6xi32>
    %19 = arith.cmpi eq, %17, %18 : vector<256x6xi32>
    %20 = arith.extui %19 : vector<256x6xi1> to vector<256x6xi32>
    %21 = arith.sitofp %20 : vector<256x6xi32> to vector<256x6xf32>
    %c0_14 = arith.constant 0 : index
    %c0_15 = arith.constant 0 : index
    %22 = vector.load %arg7[%c0_14, %c0_15] : memref<6x32xf32, #tpu.memory_space<vmem>>, vector<6x32xf32>
    %cst_16 = arith.constant dense<0.000000e+00> : vector<256x32xf32>
    %23 = tpu.matmul %21, %22, %cst_16 {dimension_numbers = #tpu.dot_dimension_numbers<[1], [0], [0], [1], [0, 0, 1, 1], [], []>} : vector<256x6xf32>, vector<6x32xf32>, vector<256x32xf32> -> vector<256x32xf32>
    %24 = arith.mulf %15, %23 : vector<256x32xf32>
    %cst_17 = arith.constant dense<0.000000e+00> : vector<256xf32>
    %25 = vector.multi_reduction <add>, %24, %cst_17 [1] : vector<256x32xf32> to vector<256xf32>
    %26 = vector.shape_cast %25 : vector<256xf32> to vector<256x1xf32>
    %c0_18 = arith.constant 0 : index
    %c0_19 = arith.constant 0 : index
    %27 = memref.load %arg8[%c0_18, %c0_19] : memref<1x1xf32, #tpu.memory_space<smem>>
    %28 = vector.broadcast %27 : f32 to vector<256x1xf32>
    %29 = arith.addf %26, %28 : vector<256x1xf32>
    %c0_20 = arith.constant 0 : index
    %c0_21 = arith.constant 0 : index
    %30 = vector.load %arg9[%c0_20, %c0_21] : memref<256x1xf32, #tpu.memory_space<vmem>>, vector<256x1xf32>
    tpu.vector_store %arg9[%c0_20, %c0_21], %29 {strides = array<i32>} : memref<256x1xf32, #tpu.memory_space<vmem>>, vector<256x1xf32>,
    return
  }
  func.func @transform_0(%arg0: i32) -> (i32, i32) {
    %c0_i32 = arith.constant 0 : i32
    %c0_i32_0 = arith.constant 0 : i32
    return %arg0, %c0_i32 : i32, i32
  }
  func.func @transform_1(%arg0: i32) -> (i32, i32) {
    %c0_i32 = arith.constant 0 : i32
    %c0_i32_0 = arith.constant 0 : i32
    return %arg0, %c0_i32 : i32, i32
  }
  func.func @transform_2(%arg0: i32) -> (i32, i32) {
    %c0_i32 = arith.constant 0 : i32
    %c0_i32_0 = arith.constant 0 : i32
    %c0_i32_1 = arith.constant 0 : i32
    return %c0_i32, %c0_i32_0 : i32, i32
  }
  func.func @transform_3(%arg0: i32) -> (i32, i32) {
    %c0_i32 = arith.constant 0 : i32
    %c0_i32_0 = arith.constant 0 : i32
    %c0_i32_1 = arith.constant 0 : i32
    return %c0_i32, %c0_i32_0 : i32, i32
  }
  func.func @transform_4(%arg0: i32) -> (i32, i32) {
    %c0_i32 = arith.constant 0 : i32
    %c0_i32_0 = arith.constant 0 : i32
    %c0_i32_1 = arith.constant 0 : i32
    return %c0_i32, %c0_i32_0 : i32, i32
  }
  func.func @transform_5(%arg0: i32) -> (i32, i32) {
    %c0_i32 = arith.constant 0 : i32
    %c0_i32_0 = arith.constant 0 : i32
    %c0_i32_1 = arith.constant 0 : i32
    return %c0_i32, %c0_i32_0 : i32, i32
  }
  func.func @transform_6(%arg0: i32) -> (i32, i32) {
    %c0_i32 = arith.constant 0 : i32
    %c0_i32_0 = arith.constant 0 : i32
    %c0_i32_1 = arith.constant 0 : i32
    return %c0_i32, %c0_i32_0 : i32, i32
  }
  func.func @transform_7(%arg0: i32) -> (i32, i32) {
    %c0_i32 = arith.constant 0 : i32
    %c0_i32_0 = arith.constant 0 : i32
    %c0_i32_1 = arith.constant 0 : i32
    return %c0_i32, %c0_i32_0 : i32, i32
  }
  func.func @transform_8(%arg0: i32) -> (i32, i32) {
    %c0_i32 = arith.constant 0 : i32
    %c0_i32_0 = arith.constant 0 : i32
    return %arg0, %c0_i32 : i32, i32
  }
}

</mosaic_0001>

<bundles_post_ra>
// kernel: tpu_custom_call.1
= control target key start
LH: loop header
LB: loop body
LE: loop exit
PB: predicated region body
PF: predicated region fallthrough
CT: control target
= control target key end

     0   :  { %s2250_s29 = smov 0   ;;  %s2774_s0 = inlined_call_operand.vmem [shape: bf16[512,32], index: 0, kind: input, shape index: {}]   ;;  %s2775_s1 = inlined_call_operand.vmem [shape: s32[512,1], index: 1, kind: input, shape index: {}]   ;;  %s2776_s2 = inlined_call_operand.vmem [shape: bf16[32,64], index: 2, kind: input, shape index: {}]   ;;  %s2777_s3 = inlined_call_operand.vmem [shape: f32[1,64], index: 3, kind: input, shape index: {}]   ;;  %s2778_s4 = inlined_call_operand.vmem [shape: bf16[64,32], index: 4, kind: input, shape index: {}]   ;;  %s2779_s5 = inlined_call_operand.vmem [shape: f32[1,32], index: 5, kind: input, shape index: {}]   ;;  %s2780_s6 = inlined_call_operand.vmem [shape: f32[6,32], index: 6, kind: input, shape index: {}]   ;;  %s2781_s7 = inlined_call_operand.<no memory space> [shape: f32[1,1], index: 7, kind: input, shape index: {}]   ;;  %s2782_s8 = inlined_call_operand.vmem [shape: f32[512,1], index: 8, kind: output, shape index: {}]  }
   0x1   :  { %13 = sst [smem:[#allocation2]] %s2781_s7 }
   0x2 LB: > { %s1823_s30 = sadd.s32 4294967295, %s2198_s29   ;;  %p1827_p0 = scmp.ge.s32.totalorder %s2198_s29, 1  ;;  %s2198_s29 = sphi %s2250_s29, %s19_s29  }
   0x3   : > { %p275_p1 = scmp.lt.s32.totalorder %s2198_s29, 3 }
   0x5   : > { %p276_p2 = pnand %p1827_p0, %p275_p1 }
   0x6   : > { %v2170_v0 = vld [vmem:[%s2776_s2] sm:$0xff] (!%p276_p2)   ;;  %s1828_s7 = sshll.u32 (!%p276_p2), %s1823_s30, 5  ;;  %v2171_v1 = vld [vmem:[%s2776_s2 + $0x8] sm:$0xff] (!%p276_p2)   ;;  %v2200_v2 = vmov (!%p276_p2), 0   ;;  %vm468_vm0 = vcmask (!%p276_p2), 261120   ;;  %vm1331_vm1 = vcmask (!%p276_p2), 1045504   ;;  %v1039_v56 = vlaneseq (!%p276_p2) }
   0x7   : > { %279 = sbr.rel (%p276_p2) target bundleno = 669 (0x29d), region = 52  ;;  %p315_p3 = scmp.lt.s32.totalorder (!%p276_p2), %s1828_s7, 63  ;;  %2028 = vmatprep.subr.bf16.mxu0 (!%p276_p2), %v2170_v0  ;;  %2154 = vmatprep.subr.bf16.mxu1 (!%p276_p2), %v2170_v0  ;;  %v1233_v29 = vld [vmem:[%s2780_s6] sm:$0x3f] (!%p276_p2)  ;;  %v2189_v45 = vld [vmem:[%s2778_s4 + $0x8] sm:$0xff] (!%p276_p2)   ;;  %v2190_v50 = vld [vmem:[%s2778_s4 + $0x10] sm:$0xff] (!%p276_p2)  }
   0x8   : > { %2029 = vmatpush3.bf16.msra.mxu0 (!%p276_p2), %v2170_v0  ;;  %2156 = vmatpush3.bf16.msra.mxu1 (!%p276_p2), %v2170_v0  ;;  %v2188_v40 = vld [vmem:[%s2778_s4] sm:$0xff] (!%p276_p2)   ;;  %v2191_v55 = vld [vmem:[%s2778_s4 + $0x18] sm:$0xff] (!%p276_p2)   ;;  %v2359_v57 = vand.u32 (!%p276_p2), 127, %v1039_v56  ;;  %vm1234_vm2 = vcmask (!%p276_p2), 48128   ;;  %v2201_v60 = vmov (!%p276_p2), 0.0   ;;  %s1688_s14 = sld [smem:[#allocation2]] (!%p276_p2) }
   0x9   : > { %2030 = vmatprep.subr.bf16.mxu0 (!%p276_p2), %v2171_v1  ;;  %2168 = vset.pattern.permute.xlu0 (!%p276_p2), %v2200_v2 }
   0xa   : > { %2155 = vmatprep.subr.bf16.mxu1 (!%p276_p2), %v2171_v1  ;;  %2169 = vset.pattern.permute.xlu1 (!%p276_p2), %v2200_v2 }
   0xc   : > { %2031 = vmatpush3.bf16.msra.mxu0 (!%p276_p2), %v2171_v1  ;;  %2157 = vmatpush3.bf16.msra.mxu1 (!%p276_p2), %v2171_v1 }
   0xd   : > { %2104 = vmatprep.subr.msk.mxu0 (!%p276_p2), %vm1331_vm1, %v1233_v29  ;;  %2064 = vmatprep.subr.bf16.mxu1 (!%p276_p2), %v2188_v40 }
   0xe   : > { %s2784_s7 = smov (!%p315_p3, %s1828_s7), 63 }
   0xf   : > { %s1829_s13 = sshll.u32 %s2784_s7, 2  ;;  %s1831_s17 = sshll.u32 %s2784_s7, 3 }
  0x10   : > { %s2270_s16 = scalar_lea.vmem %s2774_s0, %s1829_s13  ;;  %s2284_s20 = scalar_lea.vmem %s2775_s1, %s1831_s17 }
  0x11   : > { %v2172_v3 = vld [vmem:[%s2270_s16] sm:$0xff]   ;;  %v2173_v4 = vld [vmem:[%s2270_s16 + $0x8] sm:$0xff]   ;;  %v2174_v5 = vld [vmem:[%s2270_s16 + $0x10] sm:$0xff]   ;;  %s2673_s18 = scalar_lea.vmem %s2782_s8, %s1831_s17 }
  0x12   : > { %2032 = vmatprep.mubr.msk.bf16.mxu0 %vm468_vm0, %v2172_v3  ;;  %v2175_v6 = vld [vmem:[%s2270_s16 + $0x18] sm:$0xff]   ;;  %v2176_v7 = vld [vmem:[%s2270_s16 + $0x20] sm:$0xff]   ;;  %v1009_v10 = vld [vmem:[%s2284_s20 + $0x10] sm:$0xff] }
  0x13   : > { %2033 = vmatmul.mubr.msk.bf16.vlgmr.msra.gmra.mrb[0].mxu0 %vm468_vm0, %v2173_v4  ;;  %v1007_v8 = vld [vmem:[%s2284_s20] sm:$0xff]  ;;  %v1008_v11 = vld [vmem:[%s2284_s20 + $0x8] sm:$0xff]  ;;  %1048 = vperm.xlu1 %2169, %v1009_v10   ;;  %v1010_v13 = vld [vmem:[%s2284_s20 + $0x18] sm:$0xff] }
  0x14   : > { %2036 = vmatprep.mubr.msk.bf16.mxu0 %vm468_vm0, %v2174_v5  ;;  %1042 = vperm.xlu0 %2168, %v1007_v8   ;;  %v2180_v9 = vld [vmem:[%s2270_s16 + $0x40] sm:$0xff]   ;;  %v2181_v12 = vld [vmem:[%s2270_s16 + $0x48] sm:$0xff]   ;;  %v2182_v14 = vld [vmem:[%s2270_s16 + $0x50] sm:$0xff]  }
  0x15   : > { %2048 = vmatprep.mubr.msk.bf16.mxu1 %vm468_vm0, %v2180_v9  ;;  %v2177_v15 = vld [vmem:[%s2270_s16 + $0x28] sm:$0xff]   ;;  %v2178_v16 = vld [vmem:[%s2270_s16 + $0x30] sm:$0xff]   ;;  %v1011_v17 = vld [vmem:[%s2284_s20 + $0x20] sm:$0xff]  ;;  %2105 = vmatpush3.msk.msra.mxu0 %vm1331_vm1, %v1233_v29 }
  0x16   : > { %2049 = vmatmul.mubr.msk.bf16.vlgmr.msra.gmra.mrb[0].mxu1 %vm468_vm0, %v2181_v12  ;;  %v1012_v18 = vld [vmem:[%s2284_s20 + $0x28] sm:$0xff]  ;;  %v2183_v19 = vld [vmem:[%s2270_s16 + $0x58] sm:$0xff]   ;;  %v2184_v20 = vld [vmem:[%s2270_s16 + $0x60] sm:$0xff]  }
  0x17   : > { %1051 = vperm.xlu1 %2169, %v1010_v13   ;;  %2052 = vmatprep.mubr.msk.bf16.mxu1 %vm468_vm0, %v2182_v14  ;;  %v1013_v21 = vld [vmem:[%s2284_s20 + $0x30] sm:$0xff]  ;;  %v1014_v22 = vld [vmem:[%s2284_s20 + $0x38] sm:$0xff]  ;;  %v1015_v23 = vld [vmem:[%s2284_s20 + $0x40] sm:$0xff] }
  0x18   : > { %1045 = vperm.xlu0 %2168, %v1008_v11   ;;  %v2179_v24 = vld [vmem:[%s2270_s16 + $0x38] sm:$0xff]   ;;  %v1016_v25 = vld [vmem:[%s2284_s20 + $0x48] sm:$0xff]  ;;  %v2186_v27 = vld [vmem:[%s2270_s16 + $0x70] sm:$0xff]   ;;  %2065 = vmatpush3.bf16.msra.mxu1 %v2188_v40 }
  0x19   : > { %v2185_v26 = vld [vmem:[%s2270_s16 + $0x68] sm:$0xff]   ;;  %v1017_v28 = vld [vmem:[%s2284_s20 + $0x50] sm:$0xff]  ;;  %v1018_v30 = vld [vmem:[%s2284_s20 + $0x58] sm:$0xff]  ;;  %2066 = vmatprep.subr.bf16.mxu1 %v2189_v45 }
  0x1a   : > { %v1019_v31 = vld [vmem:[%s2284_s20 + $0x60] sm:$0xff]  ;;  %v1020_v32 = vld [vmem:[%s2284_s20 + $0x68] sm:$0xff]  ;;  %v2187_v33 = vld [vmem:[%s2270_s16 + $0x78] sm:$0xff]  }
  0x1b   : > { %2037 = vmatmul.mubr.msk.bf16.gmra.mrb[4].mxu0 %vm468_vm0, %v2175_v6  ;;  %1057 = vperm.xlu1 %2169, %v1012_v18   ;;  %v1021_v34 = vld [vmem:[%s2284_s20 + $0x70] sm:$0xff]  ;;  %v1022_v35 = vld [vmem:[%s2284_s20 + $0x78] sm:$0xff]  ;;  %v1023_v36 = vld [vmem:[%s2284_s20 + $0x80] sm:$0xff] }
  0x1c   : > { %2040 = vmatprep.mubr.msk.bf16.mxu0 %vm468_vm0, %v2176_v7  ;;  %1054 = vperm.xlu0 %2168, %v1011_v17   ;;  %v1024_v37 = vld [vmem:[%s2284_s20 + $0x88] sm:$0xff]  ;;  %v1025_v38 = vld [vmem:[%s2284_s20 + $0x90] sm:$0xff]  ;;  %v1026_v39 = vld [vmem:[%s2284_s20 + $0x98] sm:$0xff] }
  0x1d   : > { %v1027_v41 = vld [vmem:[%s2284_s20 + $0xa0] sm:$0xff]  ;;  %v1028_v42 = vld [vmem:[%s2284_s20 + $0xa8] sm:$0xff]  ;;  %v1029_v43 = vld [vmem:[%s2284_s20 + $0xb0] sm:$0xff]  ;;  %2067 = vmatpush3.bf16.msra.mxu1 %v2189_v45 }
  0x1e   : > { %2053 = vmatmul.mubr.msk.bf16.gmra.mrb[4].mxu1 %vm468_vm0, %v2183_v19  ;;  %v1030_v44 = vld [vmem:[%s2284_s20 + $0xb8] sm:$0xff]  ;;  %v1031_v46 = vld [vmem:[%s2284_s20 + $0xc0] sm:$0xff]  ;;  %v1032_v47 = vld [vmem:[%s2284_s20 + $0xc8] sm:$0xff]  ;;  %2068 = vmatprep.subr.bf16.mxu1 %v2190_v50 }
  0x1f   : > { %2056 = vmatprep.mubr.msk.bf16.mxu1 %vm468_vm0, %v2184_v20  ;;  %1063 = vperm.xlu1 %2169, %v1014_v22   ;;  %v1033_v48 = vld [vmem:[%s2284_s20 + $0xd0] sm:$0xff]  ;;  %v1034_v49 = vld [vmem:[%s2284_s20 + $0xd8] sm:$0xff]  ;;  %v1035_v51 = vld [vmem:[%s2284_s20 + $0xe0] sm:$0xff] }
  0x20   : > { %1060 = vperm.xlu0 %2168, %v1013_v21   ;;  %v1036_v52 = vld [vmem:[%s2284_s20 + $0xe8] sm:$0xff]  ;;  %v1037_v53 = vld [vmem:[%s2284_s20 + $0xf0] sm:$0xff]  ;;  %v1038_v54 = vld [vmem:[%s2284_s20 + $0xf8] sm:$0xff] }
  0x21   : > { %2069 = vmatpush3.bf16.msra.mxu1 %v2190_v50 }
  0x22   : > { %2070 = vmatprep.subr.bf16.mxu1 %v2191_v55 }
  0x23   : > { %2041 = vmatmul.mubr.msk.bf16.gmra.mrb[8].mxu0 %vm468_vm0, %v2177_v15  ;;  %1069 = vperm.xlu1 %2169, %v1016_v25  }
  0x24   : > { %2044 = vmatprep.mubr.msk.bf16.mxu0 %vm468_vm0, %v2178_v16  ;;  %1066 = vperm.xlu0 %2168, %v1015_v23  }
  0x25   : > { %2071 = vmatpush3.bf16.msra.mxu1 %v2191_v55 }
  0x26   : > { %2057 = vmatmul.mubr.msk.bf16.gmra.mrb[8].mxu1 %vm468_vm0, %v2185_v26 }
  0x27   : > { %2060 = vmatprep.mubr.msk.bf16.mxu1 %vm468_vm0, %v2186_v27  ;;  %1075 = vperm.xlu1 %2169, %v1018_v30  }
  0x28   : > { %1072 = vperm.xlu0 %2168, %v1017_v28  }
  0x2b   : > { %2045 = vmatmul.mubr.msk.bf16.gmra.mrb[12].mxu0 %vm468_vm0, %v2179_v24  ;;  %1081 = vperm.xlu1 %2169, %v1020_v32  }
  0x2c   : > { %1078 = vperm.xlu0 %2168, %v1019_v31  }
  0x2e   : > { %2061 = vmatmul.mubr.msk.bf16.gmra.mrb[12].mxu1 %vm468_vm0, %v2187_v33 }
  0x2f   : > { %1087 = vperm.xlu1 %2169, %v1022_v35  }
  0x30   : > { %1084 = vperm.xlu0 %2168, %v1021_v34  }
  0x33   : > { %1093 = vperm.xlu1 %2169, %v1024_v37  }
  0x34   : > { %1090 = vperm.xlu0 %2168, %v1023_v36  }
  0x37   : > { %1099 = vperm.xlu1 %2169, %v1026_v39  }
  0x38   : > { %1096 = vperm.xlu0 %2168, %v1025_v38  }
  0x3b   : > { %1105 = vperm.xlu1 %2169, %v1028_v42  }
  0x3c   : > { %1102 = vperm.xlu0 %2168, %v1027_v41  }
  0x3f   : > { %1111 = vperm.xlu1 %2169, %v1030_v44  }
  0x40   : > { %1108 = vperm.xlu0 %2168, %v1029_v43  }
  0x43   : > { %1117 = vperm.xlu1 %2169, %v1032_v47  }
  0x44   : > { %1114 = vperm.xlu0 %2168, %v1031_v46  }
  0x47   : > { %1123 = vperm.xlu1 %2169, %v1034_v49  }
  0x48   : > { %1120 = vperm.xlu0 %2168, %v1033_v48  }
  0x4b   : > { %1129 = vperm.xlu1 %2169, %v1036_v52  }
  0x4c   : > { %1126 = vperm.xlu0 %2168, %v1035_v51  }
  0x4f   : > { %1135 = vperm.xlu1 %2169, %v1038_v54  }
  0x50   : > { %1132 = vperm.xlu0 %2168, %v1037_v53  }
  0x92   : > { %v1049_v59 = vpop.permute.xlu1 %1048 }
  0x93   : > { %v1043_v58 = vpop.permute.xlu0 %1042  ;;  %vm1139_vm4 = vcmp.eq.s32.totalorder %v2359_v57, %v1049_v59 }
  0x94   : > { %vm1137_vm3 = vcmp.eq.s32.totalorder %v2359_v57, %v1043_v58  ;;  %v1892_v63 = vsel %vm1139_vm4, 1.0, %v2201_v60 }
  0x95   : > { %v1890_v61 = vsel %vm1137_vm3, 1.0, %v2201_v60 }
  0x96   : > { %2106 = vmatprep.mubr.msk.f32.mxu0 %vm1234_vm2, %v1890_v61  ;;  %v1052_v0 = vpop.permute.xlu1 %1051  ;;  %v2460_v61 = vld [vmem:[%s2777_s3] ss:$0 sm:$0xff] }
  0x97   : > { %v1046_v62 = vpop.permute.xlu0 %1045  ;;  %vm1140_vm6 = vcmp.eq.s32.totalorder %v2359_v57, %v1052_v0 }
  0x98   : > { %vm1138_vm5 = vcmp.eq.s32.totalorder %v2359_v57, %v1046_v62  ;;  %v1893_v2 = vsel %vm1140_vm6, 1.0, %v2201_v60 }
  0x99   : > { %v1891_v1 = vsel %vm1138_vm5, 1.0, %v2201_v60 }
  0x9a   : > { %2107 = vmatmul.mubr.msk.f32.vlgmr.msra.gmra.mrb[16].mxu0 %vm1234_vm2, %v1891_v1  ;;  %v1058_v4 = vpop.permute.xlu1 %1057 }
  0x9b   : > { %v1055_v3 = vpop.permute.xlu0 %1054  ;;  %2109 = vmatprep.mubr.msk.f32.mxu0 %vm1234_vm2, %v1892_v63  ;;  %vm1142_vm8 = vcmp.eq.s32.totalorder %v2359_v57, %v1058_v4 }
  0x9c   : > { %vm1141_vm7 = vcmp.eq.s32.totalorder %v2359_v57, %v1055_v3  ;;  %v1895_v6 = vsel %vm1142_vm8, 1.0, %v2201_v60 }
  0x9d   : > { %v1894_v5 = vsel %vm1141_vm7, 1.0, %v2201_v60 }
  0x9e   : > { %2110 = vmatmul.mubr.msk.f32.gmra.mrb[18].mxu0 %vm1234_vm2, %v1893_v2  ;;  %v1064_v8 = vpop.permute.xlu1 %1063 }
  0x9f   : > { %v1061_v7 = vpop.permute.xlu0 %1060  ;;  %2112 = vmatprep.mubr.msk.f32.mxu0 %vm1234_vm2, %v1894_v5  ;;  %vm1144_vm10 = vcmp.eq.s32.totalorder %v2359_v57, %v1064_v8 }
  0xa0   : > { %vm1143_vm9 = vcmp.eq.s32.totalorder %v2359_v57, %v1061_v7  ;;  %v1897_v10 = vsel %vm1144_vm10, 1.0, %v2201_v60 }
  0xa1   : > { %v1896_v9 = vsel %vm1143_vm9, 1.0, %v2201_v60 }
  0xa2   : > { %2113 = vmatmul.mubr.msk.f32.gmra.mrb[20].mxu0 %vm1234_vm2, %v1895_v6  ;;  %v1070_v12 = vpop.permute.xlu1 %1069 }
  0xa3   : > { %v1067_v11 = vpop.permute.xlu0 %1066  ;;  %2115 = vmatprep.mubr.msk.f32.mxu0 %vm1234_vm2, %v1896_v9  ;;  %vm1146_vm12 = vcmp.eq.s32.totalorder %v2359_v57, %v1070_v12 }
  0xa4   : > { %vm1145_vm11 = vcmp.eq.s32.totalorder %v2359_v57, %v1067_v11  ;;  %v1899_v14 = vsel %vm1146_vm12, 1.0, %v2201_v60 }
  0xa5   : > { %v1898_v13 = vsel %vm1145_vm11, 1.0, %v2201_v60 }
  0xa6   : > { %2116 = vmatmul.mubr.msk.f32.gmra.mrb[22].mxu0 %vm1234_vm2, %v1897_v10  ;;  %v1076_v16 = vpop.permute.xlu1 %1075 }
  0xa7   : > { %v1073_v15 = vpop.permute.xlu0 %1072  ;;  %2118 = vmatprep.mubr.msk.f32.mxu0 %vm1234_vm2, %v1898_v13  ;;  %vm1148_vm14 = vcmp.eq.s32.totalorder %v2359_v57, %v1076_v16 }
  0xa8   : > { %vm1147_vm13 = vcmp.eq.s32.totalorder %v2359_v57, %v1073_v15  ;;  %v1901_v18 = vsel %vm1148_vm14, 1.0, %v2201_v60 }
  0xa9   : > { %v1900_v17 = vsel %vm1147_vm13, 1.0, %v2201_v60 }
  0xaa   : > { %2119 = vmatmul.mubr.msk.f32.gmra.mrb[24].mxu0 %vm1234_vm2, %v1899_v14  ;;  %v1082_v20 = vpop.permute.xlu1 %1081 }
  0xab   : > { %v1079_v19 = vpop.permute.xlu0 %1078  ;;  %2121 = vmatprep.mubr.msk.f32.mxu0 %vm1234_vm2, %v1900_v17  ;;  %vm1150_vm1 = vcmp.eq.s32.totalorder %v2359_v57, %v1082_v20 }
  0xac   : > { %vm1149_vm15 = vcmp.eq.s32.totalorder %v2359_v57, %v1079_v19  ;;  %v1903_v22 = vsel %vm1150_vm1, 1.0, %v2201_v60 }
  0xad   : > { %v1902_v21 = vsel %vm1149_vm15, 1.0, %v2201_v60 }
  0xae   : > { %2122 = vmatmul.mubr.msk.f32.gmra.mrb[26].mxu0 %vm1234_vm2, %v1901_v18  ;;  %v1088_v24 = vpop.permute.xlu1 %1087 }
  0xaf   : > { %v1085_v23 = vpop.permute.xlu0 %1084  ;;  %2124 = vmatprep.mubr.msk.f32.mxu0 %vm1234_vm2, %v1902_v21  ;;  %vm1152_vm4 = vcmp.eq.s32.totalorder %v2359_v57, %v1088_v24 }
  0xb0   : > { %vm1151_vm3 = vcmp.eq.s32.totalorder %v2359_v57, %v1085_v23  ;;  %v1905_v26 = vsel %vm1152_vm4, 1.0, %v2201_v60 }
  0xb1   : > { %v1904_v25 = vsel %vm1151_vm3, 1.0, %v2201_v60 }
  0xb2   : > { %2125 = vmatmul.mubr.msk.f32.gmra.mrb[28].mxu0 %vm1234_vm2, %v1903_v22  ;;  %v1094_v28 = vpop.permute.xlu1 %1093 }
  0xb3   : > { %v1091_v27 = vpop.permute.xlu0 %1090  ;;  %2127 = vmatprep.mubr.msk.f32.mxu0 %vm1234_vm2, %v1904_v25  ;;  %vm1154_vm6 = vcmp.eq.s32.totalorder %v2359_v57, %v1094_v28 }
  0xb4   : > { %vm1153_vm5 = vcmp.eq.s32.totalorder %v2359_v57, %v1091_v27  ;;  %v1907_v30 = vsel %vm1154_vm6, 1.0, %v2201_v60 }
  0xb5   : > { %v1906_v29 = vsel %vm1153_vm5, 1.0, %v2201_v60 }
  0xb6   : > { %2128 = vmatmul.mubr.msk.f32.gmra.mrb[30].mxu0 %vm1234_vm2, %v1905_v26  ;;  %v1100_v32 = vpop.permute.xlu1 %1099 }
  0xb7   : > { %v1097_v31 = vpop.permute.xlu0 %1096  ;;  %2130 = vmatprep.mubr.msk.f32.mxu0 %vm1234_vm2, %v1906_v29  ;;  %vm1156_vm8 = vcmp.eq.s32.totalorder %v2359_v57, %v1100_v32 }
  0xb8   : > { %vm1155_vm7 = vcmp.eq.s32.totalorder %v2359_v57, %v1097_v31  ;;  %v1909_v34 = vsel %vm1156_vm8, 1.0, %v2201_v60 }
  0xb9   : > { %v1908_v33 = vsel %vm1155_vm7, 1.0, %v2201_v60  ;;  %vm1722_vm7 = vcmask 7168  }
  0xba   : > { %2131 = vmatmul.mubr.msk.f32.gmra.mrb[32].mxu0 %vm1234_vm2, %v1907_v30  ;;  %v1106_v36 = vpop.permute.xlu1 %1105 }
  0xbb   : > { %v1103_v35 = vpop.permute.xlu0 %1102  ;;  %2133 = vmatprep.mubr.msk.f32.mxu0 %vm1234_vm2, %v1908_v33  ;;  %vm1158_vm10 = vcmp.eq.s32.totalorder %v2359_v57, %v1106_v36 }
  0xbc   : > { %vm1157_vm9 = vcmp.eq.s32.totalorder %v2359_v57, %v1103_v35  ;;  %v1911_v38 = vsel %vm1158_vm10, 1.0, %v2201_v60 }
  0xbd   : > { %v1910_v37 = vsel %vm1157_vm9, 1.0, %v2201_v60 }
  0xbe   : > { %2134 = vmatmul.mubr.msk.f32.gmra.mrb[34].mxu0 %vm1234_vm2, %v1909_v34  ;;  %v1112_v40 = vpop.permute.xlu1 %1111 }
  0xbf   : > { %v1109_v39 = vpop.permute.xlu0 %1108  ;;  %2136 = vmatprep.mubr.msk.f32.mxu0 %vm1234_vm2, %v1910_v37  ;;  %vm1160_vm12 = vcmp.eq.s32.totalorder %v2359_v57, %v1112_v40 }
  0xc0   : > { %vm1159_vm11 = vcmp.eq.s32.totalorder %v2359_v57, %v1109_v39  ;;  %v1913_v42 = vsel %vm1160_vm12, 1.0, %v2201_v60 }
  0xc1   : > { %v1912_v41 = vsel %vm1159_vm11, 1.0, %v2201_v60 }
  0xc2   : > { %2137 = vmatmul.mubr.msk.f32.gmra.mrb[36].mxu0 %vm1234_vm2, %v1911_v38  ;;  %v1118_v44 = vpop.permute.xlu1 %1117 }
  0xc3   : > { %v1115_v43 = vpop.permute.xlu0 %1114  ;;  %2139 = vmatprep.mubr.msk.f32.mxu0 %vm1234_vm2, %v1912_v41  ;;  %vm1162_vm14 = vcmp.eq.s32.totalorder %v2359_v57, %v1118_v44 }
  0xc4   : > { %vm1161_vm13 = vcmp.eq.s32.totalorder %v2359_v57, %v1115_v43  ;;  %v1915_v46 = vsel %vm1162_vm14, 1.0, %v2201_v60 }
  0xc5   : > { %v1914_v45 = vsel %vm1161_vm13, 1.0, %v2201_v60 }
  0xc6   : > { %2140 = vmatmul.mubr.msk.f32.gmra.mrb[38].mxu0 %vm1234_vm2, %v1913_v42  ;;  %v1124_v48 = vpop.permute.xlu1 %1123 }
  0xc7   : > { %v1121_v47 = vpop.permute.xlu0 %1120  ;;  %2142 = vmatprep.mubr.msk.f32.mxu0 %vm1234_vm2, %v1914_v45  ;;  %vm1164_vm1 = vcmp.eq.s32.totalorder %v2359_v57, %v1124_v48 }
  0xc8   : > { %vm1163_vm15 = vcmp.eq.s32.totalorder %v2359_v57, %v1121_v47  ;;  %v1917_v50 = vsel %vm1164_vm1, 1.0, %v2201_v60 }
  0xc9   : > { %v1916_v49 = vsel %vm1163_vm15, 1.0, %v2201_v60 }
  0xca   : > { %2143 = vmatmul.mubr.msk.f32.gmra.mrb[40].mxu0 %vm1234_vm2, %v1915_v46  ;;  %v1130_v52 = vpop.permute.xlu1 %1129 }
  0xcb   : > { %v1127_v51 = vpop.permute.xlu0 %1126  ;;  %2145 = vmatprep.mubr.msk.f32.mxu0 %vm1234_vm2, %v1916_v49  ;;  %vm1166_vm4 = vcmp.eq.s32.totalorder %v2359_v57, %v1130_v52 }
  0xcc   : > { %vm1165_vm3 = vcmp.eq.s32.totalorder %v2359_v57, %v1127_v51  ;;  %v1919_v54 = vsel %vm1166_vm4, 1.0, %v2201_v60 }
  0xcd   : > { %v1918_v53 = vsel %vm1165_vm3, 1.0, %v2201_v60 }
  0xce   : > { %2146 = vmatmul.mubr.msk.f32.gmra.mrb[42].mxu0 %vm1234_vm2, %v1917_v50  ;;  %v1136_v56 = vpop.permute.xlu1 %1135 }
  0xcf   : > { %v1133_v55 = vpop.permute.xlu0 %1132  ;;  %2148 = vmatprep.mubr.msk.f32.mxu0 %vm1234_vm2, %v1918_v53  ;;  %vm1168_vm6 = vcmp.eq.s32.totalorder %v2359_v57, %v1136_v56 }
  0xd0   : > { %vm1167_vm5 = vcmp.eq.s32.totalorder %v2359_v57, %v1133_v55  ;;  %v1921_v59 = vsel %vm1168_vm6, 1.0, %v2201_v60 }
  0xd1   : > { %v1920_v58 = vsel %vm1167_vm5, 1.0, %v2201_v60 }
  0xd2   : > { %2149 = vmatmul.mubr.msk.f32.gmra.mrb[44].mxu0 %vm1234_vm2, %v1919_v54 }
  0xd3   : > { %2151 = vmatprep.mubr.msk.f32.mxu0 %vm1234_vm2, %v1920_v58 }
  0xd6   : > { %2152 = vmatmul.mubr.msk.f32.gmra.mrb[46].mxu0 %vm1234_vm2, %v1921_v59  ;;  %vm765_vm2 = vcmask 523264  }
  0xe6   : > { %v2034_v62 = vpop.f32.mrb[0].mxu0 }
  0xe7   : > { %v560_v63 = vadd.f32 %v2034_v62, %v2460_v61  ;;  %v551_v0 = vpop.f32.mrb[1].mxu0 }
  0xe8   : > { %v552_v1 = vadd.f32 %v2460_v61, %v551_v0  ;;  %v2035_v57 = vpop.f32.mrb[2].mxu0 }
  0xe9   : > { %v563_v2 = vadd.f32 %v2035_v57, %v2460_v61  ;;  %v554_v3 = vpop.f32.mrb[3].mxu0  ;;  %v680_v4 = vmax.f32 %v560_v63, 0.0  ;;  %v2050_v13 = vpop.f32.mrb[0].mxu1 }
  0xea   : > { %v555_v60 = vadd.f32 %v2460_v61, %v554_v3  ;;  %v678_v6 = vmax.f32 %v552_v1, 0.0  ;;  %v624_v16 = vadd.f32 %v2050_v13, %v2460_v61  ;;  %v615_v17 = vpop.f32.mrb[1].mxu1 }
  0xeb   : > { %v681_v5 = vmax.f32 %v563_v2, 0.0  ;;  %v616_v21 = vadd.f32 %v2460_v61, %v615_v17  ;;  %v2051_v22 = vpop.f32.mrb[2].mxu1 }
  0xec   : > { %v679_v7 = vmax.f32 %v555_v60, 0.0  ;;  %v696_v24 = vmax.f32 %v624_v16, 0.0  ;;  %v627_v25 = vadd.f32 %v2051_v22, %v2460_v61  ;;  %v618_v26 = vpop.f32.mrb[3].mxu1 }
  0xed   : > { %v711_v8 = vpack.c.bf16 %v681_v5, %v680_v4  ;;  %v694_v28 = vmax.f32 %v616_v21, 0.0  ;;  %v619_v29 = vadd.f32 %v2460_v61, %v618_v26 }
  0xee   : > { %v710_v9 = vpack.c.bf16 %v679_v7, %v678_v6  ;;  %v2038_v10 = vpop.f32.mrb[4].mxu0  ;;  %v697_v32 = vmax.f32 %v627_v25, 0.0 }
  0xef   : > { %v576_v11 = vadd.f32 %v2038_v10, %v2460_v61  ;;  %v567_v12 = vpop.f32.mrb[5].mxu0  ;;  %v695_v34 = vmax.f32 %v619_v29, 0.0 }
  0xf0   : > { %v568_v14 = vadd.f32 %v2460_v61, %v567_v12  ;;  %v2039_v15 = vpop.f32.mrb[6].mxu0  ;;  %2072 = vmatprep.mubr.msk.bf16.mxu1 %vm765_vm2, %v710_v9  ;;  %v2476_v37 = vpack.c.bf16 %v697_v32, %v696_v24 }
  0xf1   : > { %v684_v18 = vmax.f32 %v576_v11, 0.0  ;;  %v579_v19 = vadd.f32 %v2039_v15, %v2460_v61  ;;  %v570_v20 = vpop.f32.mrb[7].mxu0  ;;  %2073 = vmatmul.mubr.msk.bf16.vlgmr.msra.gmra.mrb[16].mxu1 %vm765_vm2, %v711_v8  ;;  %v2479_v40 = vpack.c.bf16 %v695_v34, %v694_v28  ;;  %v2054_v41 = vpop.f32.mrb[4].mxu1 }
  0xf2   : > { %v571_v23 = vadd.f32 %v2460_v61, %v570_v20  ;;  %v682_v30 = vmax.f32 %v568_v14, 0.0  ;;  %v640_v44 = vadd.f32 %v2054_v41, %v2460_v61  ;;  %v631_v45 = vpop.f32.mrb[5].mxu1 }
  0xf3   : > { %v685_v27 = vmax.f32 %v579_v19, 0.0  ;;  %v632_v49 = vadd.f32 %v2460_v61, %v631_v45  ;;  %v2055_v50 = vpop.f32.mrb[6].mxu1 }
  0xf4   : > { %v683_v31 = vmax.f32 %v571_v23, 0.0  ;;  %v700_v52 = vmax.f32 %v640_v44, 0.0  ;;  %v643_v53 = vadd.f32 %v2055_v50, %v2460_v61  ;;  %v634_v54 = vpop.f32.mrb[7].mxu1 }
  0xf5   : > { %v713_v33 = vpack.c.bf16 %v685_v27, %v684_v18  ;;  %v698_v56 = vmax.f32 %v632_v49, 0.0  ;;  %v635_v58 = vadd.f32 %v2460_v61, %v634_v54 }
  0xf6   : > { %v712_v35 = vpack.c.bf16 %v683_v31, %v682_v30  ;;  %v2042_v36 = vpop.f32.mrb[8].mxu0  ;;  %v701_v63 = vmax.f32 %v643_v53, 0.0 }
  0xf7   : > { %v592_v38 = vadd.f32 %v2042_v36, %v2460_v61  ;;  %v583_v39 = vpop.f32.mrb[9].mxu0  ;;  %v699_v1 = vmax.f32 %v635_v58, 0.0 }
  0xf8   : > { %v584_v42 = vadd.f32 %v2460_v61, %v583_v39  ;;  %v2043_v43 = vpop.f32.mrb[10].mxu0  ;;  %2076 = vmatprep.mubr.msk.bf16.mxu1 %vm765_vm2, %v712_v35  ;;  %v721_v3 = vpack.c.bf16 %v701_v63, %v700_v52 }
  0xf9   : > { %v688_v46 = vmax.f32 %v592_v38, 0.0  ;;  %v595_v47 = vadd.f32 %v2043_v43, %v2460_v61  ;;  %v586_v48 = vpop.f32.mrb[11].mxu0  ;;  %2077 = vmatmul.mubr.msk.bf16.gmra.mrb[20].mxu1 %vm765_vm2, %v713_v33  ;;  %v720_v5 = vpack.c.bf16 %v699_v1, %v698_v56  ;;  %v2058_v6 = vpop.f32.mrb[8].mxu1 }
  0xfa   : > { %v587_v51 = vadd.f32 %v2460_v61, %v586_v48  ;;  %v686_v59 = vmax.f32 %v584_v42, 0.0  ;;  %v656_v9 = vadd.f32 %v2058_v6, %v2460_v61  ;;  %v647_v10 = vpop.f32.mrb[9].mxu1 }
  0xfb   : > { %v689_v55 = vmax.f32 %v595_v47, 0.0  ;;  %v648_v14 = vadd.f32 %v2460_v61, %v647_v10  ;;  %v2059_v15 = vpop.f32.mrb[10].mxu1 }
  0xfc   : > { %v687_v62 = vmax.f32 %v587_v51, 0.0  ;;  %v704_v17 = vmax.f32 %v656_v9, 0.0  ;;  %v659_v18 = vadd.f32 %v2059_v15, %v2460_v61  ;;  %v650_v19 = vpop.f32.mrb[11].mxu1 }
  0xfd   : > { %v715_v0 = vpack.c.bf16 %v689_v55, %v688_v46  ;;  %v702_v21 = vmax.f32 %v648_v14, 0.0  ;;  %v651_v22 = vadd.f32 %v2460_v61, %v650_v19 }
  0xfe   : > { %v714_v57 = vpack.c.bf16 %v687_v62, %v686_v59  ;;  %v2046_v2 = vpop.f32.mrb[12].mxu0  ;;  %v705_v25 = vmax.f32 %v659_v18, 0.0 }
  0xff   : > { %v608_v60 = vadd.f32 %v2046_v2, %v2460_v61  ;;  %v599_v4 = vpop.f32.mrb[13].mxu0  ;;  %v703_v27 = vmax.f32 %v651_v22, 0.0 }
 0x100   : > { %v600_v7 = vadd.f32 %v2460_v61, %v599_v4  ;;  %v2047_v8 = vpop.f32.mrb[14].mxu0  ;;  %2080 = vmatprep.mubr.msk.bf16.mxu1 %vm765_vm2, %v714_v57  ;;  %v723_v29 = vpack.c.bf16 %v705_v25, %v704_v17 }
 0x101   : > { %v692_v11 = vmax.f32 %v608_v60, 0.0  ;;  %v611_v12 = vadd.f32 %v2047_v8, %v2460_v61  ;;  %v602_v13 = vpop.f32.mrb[15].mxu0  ;;  %2081 = vmatmul.mubr.msk.bf16.gmra.mrb[24].mxu1 %vm765_vm2, %v715_v0  ;;  %v722_v30 = vpack.c.bf16 %v703_v27, %v702_v21  ;;  %v2062_v31 = vpop.f32.mrb[12].mxu1 }
 0x102   : > { %v603_v16 = vadd.f32 %v2460_v61, %v602_v13  ;;  %v690_v23 = vmax.f32 %v600_v7, 0.0  ;;  %v672_v32 = vadd.f32 %v2062_v31, %v2460_v61  ;;  %v663_v33 = vpop.f32.mrb[13].mxu1  ;;  %v2573_v13 = vld [vmem:[%s2779_s5] ss:$0 sm:$0xff] }
 0x103   : > { %v693_v20 = vmax.f32 %v611_v12, 0.0  ;;  %v664_v34 = vadd.f32 %v2460_v61, %v663_v33  ;;  %v2063_v35 = vpop.f32.mrb[14].mxu1 }
 0x104   : > { %v691_v24 = vmax.f32 %v603_v16, 0.0  ;;  %v708_v36 = vmax.f32 %v672_v32, 0.0  ;;  %v675_v38 = vadd.f32 %v2063_v35, %v2460_v61  ;;  %v666_v39 = vpop.f32.mrb[15].mxu1 }
 0x105   : > { %v717_v26 = vpack.c.bf16 %v693_v20, %v692_v11  ;;  %v706_v41 = vmax.f32 %v664_v34, 0.0  ;;  %v667_v42 = vadd.f32 %v2460_v61, %v666_v39 }
 0x106   : > { %v716_v28 = vpack.c.bf16 %v691_v24, %v690_v23  ;;  %v709_v43 = vmax.f32 %v675_v38, 0.0 }
 0x107   : > { %v707_v44 = vmax.f32 %v667_v42, 0.0 }
 0x108   : > { %2084 = vmatprep.mubr.msk.bf16.mxu1 %vm765_vm2, %v716_v28  ;;  %v725_v45 = vpack.c.bf16 %v709_v43, %v708_v36 }
 0x109   : > { %2085 = vmatmul.mubr.msk.bf16.gmra.mrb[28].mxu1 %vm765_vm2, %v717_v26  ;;  %v724_v46 = vpack.c.bf16 %v707_v44, %v706_v41 }
 0x10a   : > { %2088 = vmatprep.mubr.msk.bf16.mxu1 %vm765_vm2, %v2479_v40 }
 0x111   : > { %2089 = vmatmul.mubr.msk.bf16.gmra.mrb[32].mxu1 %vm765_vm2, %v2476_v37 }
 0x112   : > { %2092 = vmatprep.mubr.msk.bf16.mxu1 %vm765_vm2, %v720_v5 }
 0x119   : > { %2093 = vmatmul.mubr.msk.bf16.gmra.mrb[36].mxu1 %vm765_vm2, %v721_v3 }
 0x11a   : > { %2096 = vmatprep.mubr.msk.bf16.mxu1 %vm765_vm2, %v722_v30 }
 0x121   : > { %2097 = vmatmul.mubr.msk.bf16.gmra.mrb[40].mxu1 %vm765_vm2, %v723_v29 }
 0x122   : > { %2100 = vmatprep.mubr.msk.bf16.mxu1 %vm765_vm2, %v724_v46 }
 0x129   : > { %2101 = vmatmul.mubr.msk.bf16.gmra.mrb[44].mxu1 %vm765_vm2, %v725_v45 }
 0x16d   : > { %v2108_v61 = vpop.f32.mrb[16].mxu0 }
 0x16e   : > { %v1401_v40 = vpop.f32.mrb[17].mxu0 }
 0x171   : > { %v2111_v47 = vpop.f32.mrb[18].mxu0 }
 0x172   : > { %v1411_v48 = vpop.f32.mrb[19].mxu0 }
 0x175   : > { %v2516_v49 = vpop.f32.mrb[20].mxu0 }
 0x176   : > { %v2518_v50 = vpop.f32.mrb[21].mxu0 }
 0x179   : > { %v2520_v37 = vpop.f32.mrb[22].mxu0 }
 0x17a   : > { %v1431_v51 = vpop.f32.mrb[23].mxu0 }
 0x17d   : > { %v2522_v52 = vpop.f32.mrb[24].mxu0 }
 0x17e   : > { %v2524_v53 = vpop.f32.mrb[25].mxu0 }
 0x181   : > { %v2526_v54 = vpop.f32.mrb[26].mxu0 }
 0x182   : > { %v2528_v55 = vpop.f32.mrb[27].mxu0 }
 0x185   : > { %v2530_v56 = vpop.f32.mrb[28].mxu0 }
 0x186   : > { %v2532_v58 = vpop.f32.mrb[29].mxu0 }
 0x189   : > { %v2534_v59 = vpop.f32.mrb[30].mxu0 }
 0x18a   : > { %v2536_v62 = vpop.f32.mrb[31].mxu0 }
 0x18d   : > { %v2538_v63 = vpop.f32.mrb[32].mxu0 }
 0x18e   : > { %v2540_v0 = vpop.f32.mrb[33].mxu0 }
 0x191   : > { %v2542_v1 = vpop.f32.mrb[34].mxu0 }
 0x192   : > { %v2544_v57 = vpop.f32.mrb[35].mxu0 }
 0x195   : > { %v2546_v2 = vpop.f32.mrb[36].mxu0 }
 0x196   : > { %v2548_v3 = vpop.f32.mrb[37].mxu0 }
 0x199   : > { %v2550_v60 = vpop.f32.mrb[38].mxu0 }
 0x19a   : > { %v2552_v4 = vpop.f32.mrb[39].mxu0 }
 0x19d   : > { %v2554_v5 = vpop.f32.mrb[40].mxu0 }
 0x19e   : > { %v2556_v6 = vpop.f32.mrb[41].mxu0 }
 0x1a1   : > { %v2558_v7 = vpop.f32.mrb[42].mxu0 }
 0x1a2   : > { %v2560_v8 = vpop.f32.mrb[43].mxu0 }
 0x1a5   : > { %v2562_v9 = vpop.f32.mrb[44].mxu0 }
 0x1a6   : > { %v2564_v10 = vpop.f32.mrb[45].mxu0 }
 0x1a9   : > { %v2566_v11 = vpop.f32.mrb[46].mxu0 }
 0x1aa   : > { %v2568_v12 = vpop.f32.mrb[47].mxu0 }
 0x1c4   : > { %v2074_v14 = vpop.f32.mrb[16].mxu1 }
 0x1c5   : > { %v857_v15 = vadd.f32 %v2074_v14, %v2573_v13  ;;  %v848_v16 = vpop.f32.mrb[17].mxu1 }
 0x1c6   : > { %v849_v17 = vadd.f32 %v2573_v13, %v848_v16  ;;  %v2075_v18 = vpop.f32.mrb[18].mxu1 }
 0x1c7   : > { %v977_v19 = vmax.f32 %v857_v15, 0.0  ;;  %v860_v20 = vadd.f32 %v2075_v18, %v2573_v13  ;;  %v851_v21 = vpop.f32.mrb[19].mxu1 }
 0x1c8   : > { %v975_v22 = vmax.f32 %v849_v17, 0.0  ;;  %v852_v23 = vadd.f32 %v2573_v13, %v851_v21 }
 0x1c9   : > { %v978_v24 = vmax.f32 %v860_v20, 0.0  ;;  %v1562_v25 = vmul.f32 %v1411_v48, %v977_v19 }
 0x1ca   : > { %v976_v26 = vmax.f32 %v852_v23, 0.0  ;;  %v1560_v27 = vmul.f32 %v1401_v40, %v975_v22 }
 0x1cb   : > { %v1598_v28 = vsel %vm468_vm0, %v1562_v25, 0.0  ;;  %v1563_v29 = vmul.f32 %v2111_v47, %v978_v24 }
 0x1cc   : > { %1599 = vadd.xlane.f32.xlu0 %v1598_v28  ;;  %v2078_v30 = vpop.f32.mrb[20].mxu1  ;;  %v1561_v31 = vmul.f32 %v2108_v61, %v976_v26  ;;  %v1592_v42 = vsel %vm468_vm0, %v1560_v27, 0.0 }
 0x1cd   : > { %v873_v32 = vadd.f32 %v2078_v30, %v2573_v13  ;;  %v864_v33 = vpop.f32.mrb[21].mxu1  ;;  %v1601_v48 = vsel %vm468_vm0, %v1563_v29, 0.0 }
 0x1ce   : > { %v865_v34 = vadd.f32 %v2573_v13, %v864_v33  ;;  %v2079_v35 = vpop.f32.mrb[22].mxu1  ;;  %v1595_v36 = vsel %vm468_vm0, %v1561_v31, 0.0 }
 0x1cf   : > { %v981_v38 = vmax.f32 %v873_v32, 0.0  ;;  %v876_v39 = vadd.f32 %v2079_v35, %v2573_v13  ;;  %v867_v41 = vpop.f32.mrb[23].mxu1  ;;  %1596 = vadd.xlane.f32.xlu1 %v1595_v36 }
 0x1d0   : > { %v979_v43 = vmax.f32 %v865_v34, 0.0  ;;  %v868_v44 = vadd.f32 %v2573_v13, %v867_v41  ;;  %1593 = vadd.xlane.f32.xlu0 %v1592_v42 }
 0x1d1   : > { %v982_v45 = vmax.f32 %v876_v39, 0.0  ;;  %v1566_v46 = vmul.f32 %v1431_v51, %v981_v38 }
 0x1d2   : > { %v980_v61 = vmax.f32 %v868_v44, 0.0  ;;  %v1564_v40 = vmul.f32 %v2518_v50, %v979_v43 }
 0x1d3   : > { %v1610_v47 = vsel %vm468_vm0, %v1566_v46, 0.0  ;;  %v1567_v14 = vmul.f32 %v2520_v37, %v982_v45 }
 0x1d4   : > { %v2082_v15 = vpop.f32.mrb[24].mxu1  ;;  %1611 = vadd.xlane.f32.xlu1 %v1610_v47  ;;  %1602 = vadd.xlane.f32.xlu0 %v1601_v48  ;;  %v1565_v16 = vmul.f32 %v2516_v49, %v980_v61  ;;  %v1604_v22 = vsel %vm468_vm0, %v1564_v40, 0.0 }
 0x1d5   : > { %v889_v17 = vadd.f32 %v2082_v15, %v2573_v13  ;;  %v880_v18 = vpop.f32.mrb[25].mxu1  ;;  %v1613_v23 = vsel %vm468_vm0, %v1567_v14, 0.0 }
 0x1d6   : > { %v881_v19 = vadd.f32 %v2573_v13, %v880_v18  ;;  %v2083_v51 = vpop.f32.mrb[26].mxu1  ;;  %v1607_v29 = vsel %vm468_vm0, %v1565_v16, 0.0 }
 0x1d7   : > { %v985_v20 = vmax.f32 %v889_v17, 0.0  ;;  %v892_v50 = vadd.f32 %v2083_v51, %v2573_v13  ;;  %v883_v21 = vpop.f32.mrb[27].mxu1 }
 0x1d8   : > { %v983_v37 = vmax.f32 %v881_v19, 0.0  ;;  %v884_v24 = vadd.f32 %v2573_v13, %v883_v21  ;;  %1605 = vadd.xlane.f32.xlu1 %v1604_v22  ;;  %1614 = vadd.xlane.f32.xlu0 %v1613_v23 }
 0x1d9   : > { %v986_v49 = vmax.f32 %v892_v50, 0.0  ;;  %v1570_v25 = vmul.f32 %v2528_v55, %v985_v20 }
 0x1da   : > { %v984_v26 = vmax.f32 %v884_v24, 0.0  ;;  %v1568_v27 = vmul.f32 %v2524_v53, %v983_v37 }
 0x1db   : > { %v1622_v28 = vsel %vm468_vm0, %v1570_v25, 0.0  ;;  %v1571_v30 = vmul.f32 %v2526_v54, %v986_v49 }
 0x1dc   : > { %v2086_v31 = vpop.f32.mrb[28].mxu1  ;;  %1623 = vadd.xlane.f32.xlu1 %v1622_v28  ;;  %1608 = vadd.xlane.f32.xlu0 %v1607_v29  ;;  %v1569_v32 = vmul.f32 %v2522_v52, %v984_v26  ;;  %v1616_v39 = vsel %vm468_vm0, %v1568_v27, 0.0 }
 0x1dd   : > { %v905_v33 = vadd.f32 %v2086_v31, %v2573_v13  ;;  %v896_v34 = vpop.f32.mrb[29].mxu1  ;;  %v1625_v41 = vsel %vm468_vm0, %v1571_v30, 0.0 }
 0x1de   : > { %v897_v35 = vadd.f32 %v2573_v13, %v896_v34  ;;  %v2087_v55 = vpop.f32.mrb[30].mxu1  ;;  %v1619_v61 = vsel %vm468_vm0, %v1569_v32, 0.0 }
 0x1df   : > { %v989_v36 = vmax.f32 %v905_v33, 0.0  ;;  %v908_v53 = vadd.f32 %v2087_v55, %v2573_v13  ;;  %v899_v38 = vpop.f32.mrb[31].mxu1 }
 0x1e0   : > { %v987_v54 = vmax.f32 %v897_v35, 0.0  ;;  %v900_v42 = vadd.f32 %v2573_v13, %v899_v38  ;;  %1617 = vadd.xlane.f32.xlu1 %v1616_v39  ;;  %1626 = vadd.xlane.f32.xlu0 %v1625_v41 }
 0x1e1   : > { %v990_v52 = vmax.f32 %v908_v53, 0.0  ;;  %v1574_v43 = vmul.f32 %v2536_v62, %v989_v36 }
 0x1e2   : > { %v988_v44 = vmax.f32 %v900_v42, 0.0  ;;  %v1572_v45 = vmul.f32 %v2532_v58, %v987_v54 }
 0x1e3   : > { %v1634_v46 = vsel %vm468_vm0, %v1574_v43, 0.0  ;;  %v1575_v40 = vmul.f32 %v2534_v59, %v990_v52 }
 0x1e4   : > { %v2090_v47 = vpop.f32.mrb[32].mxu1  ;;  %1635 = vadd.xlane.f32.xlu1 %v1634_v46  ;;  %1620 = vadd.xlane.f32.xlu0 %v1619_v61  ;;  %v1573_v48 = vmul.f32 %v2530_v56, %v988_v44  ;;  %v1628_v19 = vsel %vm468_vm0, %v1572_v45, 0.0 }
 0x1e5   : > { %v921_v14 = vadd.f32 %v2090_v47, %v2573_v13  ;;  %v912_v15 = vpop.f32.mrb[33].mxu1  ;;  %v1637_v51 = vsel %vm468_vm0, %v1575_v40, 0.0 }
 0x1e6   : > { %v913_v16 = vadd.f32 %v2573_v13, %v912_v15  ;;  %v2091_v62 = vpop.f32.mrb[34].mxu1  ;;  %v1631_v37 = vsel %vm468_vm0, %v1573_v48, 0.0 }
 0x1e7   : > { %v993_v17 = vmax.f32 %v921_v14, 0.0  ;;  %v924_v58 = vadd.f32 %v2091_v62, %v2573_v13  ;;  %v915_v18 = vpop.f32.mrb[35].mxu1 }
 0x1e8   : > { %v991_v59 = vmax.f32 %v913_v16, 0.0  ;;  %v916_v20 = vadd.f32 %v2573_v13, %v915_v18  ;;  %1629 = vadd.xlane.f32.xlu1 %v1628_v19  ;;  %1638 = vadd.xlane.f32.xlu0 %v1637_v51 }
 0x1e9   : > { %v994_v56 = vmax.f32 %v924_v58, 0.0  ;;  %v1578_v50 = vmul.f32 %v2544_v57, %v993_v17 }
 0x1ea   : > { %v992_v21 = vmax.f32 %v916_v20, 0.0  ;;  %v1576_v22 = vmul.f32 %v2540_v0, %v991_v59 }
 0x1eb   : > { %v1646_v23 = vsel %vm468_vm0, %v1578_v50, 0.0  ;;  %v1579_v24 = vmul.f32 %v2542_v1, %v994_v56 }
 0x1ec   : > { %v2094_v49 = vpop.f32.mrb[36].mxu1  ;;  %1647 = vadd.xlane.f32.xlu1 %v1646_v23  ;;  %1632 = vadd.xlane.f32.xlu0 %v1631_v37  ;;  %v1577_v25 = vmul.f32 %v2538_v63, %v992_v21  ;;  %v1640_v31 = vsel %vm468_vm0, %v1576_v22, 0.0 }
 0x1ed   : > { %v937_v26 = vadd.f32 %v2094_v49, %v2573_v13  ;;  %v928_v27 = vpop.f32.mrb[37].mxu1  ;;  %v1649_v32 = vsel %vm468_vm0, %v1579_v24, 0.0 }
 0x1ee   : > { %v929_v28 = vadd.f32 %v2573_v13, %v928_v27  ;;  %v2095_v57 = vpop.f32.mrb[38].mxu1  ;;  %v1643_v53 = vsel %vm468_vm0, %v1577_v25, 0.0 }
 0x1ef   : > { %v997_v29 = vmax.f32 %v937_v26, 0.0  ;;  %v940_v0 = vadd.f32 %v2095_v57, %v2573_v13  ;;  %v931_v30 = vpop.f32.mrb[39].mxu1 }
 0x1f0   : > { %v995_v1 = vmax.f32 %v929_v28, 0.0  ;;  %v932_v33 = vadd.f32 %v2573_v13, %v931_v30  ;;  %1641 = vadd.xlane.f32.xlu1 %v1640_v31  ;;  %1650 = vadd.xlane.f32.xlu0 %v1649_v32 }
 0x1f1   : > { %v998_v63 = vmax.f32 %v940_v0, 0.0  ;;  %v1582_v34 = vmul.f32 %v2552_v4, %v997_v29 }
 0x1f2   : > { %v996_v35 = vmax.f32 %v932_v33, 0.0  ;;  %v1580_v55 = vmul.f32 %v2548_v3, %v995_v1 }
 0x1f3   : > { %v1658_v36 = vsel %vm468_vm0, %v1582_v34, 0.0  ;;  %v1583_v38 = vmul.f32 %v2550_v60, %v998_v63 }
 0x1f4   : > { %v2098_v39 = vpop.f32.mrb[40].mxu1  ;;  %1659 = vadd.xlane.f32.xlu1 %v1658_v36  ;;  %1644 = vadd.xlane.f32.xlu0 %v1643_v53  ;;  %v1581_v41 = vmul.f32 %v2546_v2, %v996_v35  ;;  %v1652_v45 = vsel %vm468_vm0, %v1580_v55, 0.0 }
 0x1f5   : > { %v953_v54 = vadd.f32 %v2098_v39, %v2573_v13  ;;  %v944_v42 = vpop.f32.mrb[41].mxu1  ;;  %v1661_v46 = vsel %vm468_vm0, %v1583_v38, 0.0 }
 0x1f6   : > { %v945_v52 = vadd.f32 %v2573_v13, %v944_v42  ;;  %v2099_v4 = vpop.f32.mrb[42].mxu1  ;;  %v1655_v15 = vsel %vm468_vm0, %v1581_v41, 0.0 }
 0x1f7   : > { %v1001_v43 = vmax.f32 %v953_v54, 0.0  ;;  %v956_v3 = vadd.f32 %v2099_v4, %v2573_v13  ;;  %v947_v44 = vpop.f32.mrb[43].mxu1 }
 0x1f8   : > { %v999_v60 = vmax.f32 %v945_v52, 0.0  ;;  %v948_v61 = vadd.f32 %v2573_v13, %v947_v44  ;;  %1653 = vadd.xlane.f32.xlu1 %v1652_v45  ;;  %1662 = vadd.xlane.f32.xlu0 %v1661_v46 }
 0x1f9   : > { %v1002_v2 = vmax.f32 %v956_v3, 0.0  ;;  %v1586_v40 = vmul.f32 %v2560_v8, %v1001_v43 }
 0x1fa   : > { %v1000_v47 = vmax.f32 %v948_v61, 0.0  ;;  %v1584_v48 = vmul.f32 %v2556_v6, %v999_v60 }
 0x1fb   : > { %v1670_v14 = vsel %vm468_vm0, %v1586_v40, 0.0  ;;  %v1587_v16 = vmul.f32 %v2558_v7, %v1002_v2 }
 0x1fc   : > { %v2102_v62 = vpop.f32.mrb[44].mxu1  ;;  %1671 = vadd.xlane.f32.xlu1 %v1670_v14  ;;  %1656 = vadd.xlane.f32.xlu0 %v1655_v15  ;;  %v1585_v17 = vmul.f32 %v2554_v5, %v1000_v47  ;;  %v1664_v20 = vsel %vm468_vm0, %v1584_v48, 0.0 }
 0x1fd   : > { %v969_v58 = vadd.f32 %v2102_v62, %v2573_v13  ;;  %v960_v18 = vpop.f32.mrb[45].mxu1  ;;  %v1673_v56 = vsel %vm468_vm0, %v1587_v16, 0.0 }
 0x1fe   : > { %v961_v19 = vadd.f32 %v2573_v13, %v960_v18  ;;  %v2103_v8 = vpop.f32.mrb[46].mxu1  ;;  %v1667_v37 = vsel %vm468_vm0, %v1585_v17, 0.0 }
 0x1ff   : > { %v1005_v51 = vmax.f32 %v969_v58, 0.0  ;;  %v972_v6 = vadd.f32 %v2103_v8, %v2573_v13  ;;  %v963_v59 = vpop.f32.mrb[47].mxu1 }
 0x200   : > { %v1003_v7 = vmax.f32 %v961_v19, 0.0  ;;  %v964_v50 = vadd.f32 %v2573_v13, %v963_v59  ;;  %1665 = vadd.xlane.f32.xlu1 %v1664_v20  ;;  %1674 = vadd.xlane.f32.xlu0 %v1673_v56 }
 0x201   : > { %v1006_v5 = vmax.f32 %v972_v6, 0.0  ;;  %v1590_v21 = vmul.f32 %v2568_v12, %v1005_v51 }
 0x202   : > { %v1004_v22 = vmax.f32 %v964_v50, 0.0  ;;  %v1588_v23 = vmul.f32 %v2564_v10, %v1003_v7  ;;  %v2666_v10 = vstv %s1688_s14 }
 0x203   : > { %v1591_v24 = vmul.f32 %v2566_v11, %v1006_v5  ;;  %v1682_v26 = vsel %vm468_vm0, %v1590_v21, 0.0 }
 0x204   : > { %1668 = vadd.xlane.f32.xlu0 %v1667_v37  ;;  %v1676_v49 = vsel %vm468_vm0, %v1588_v23, 0.0  ;;  %v1589_v25 = vmul.f32 %v2562_v9, %v1004_v22 }
 0x205   : > { %1677 = vadd.xlane.f32.xlu1 %v1676_v49  ;;  %v1685_v12 = vsel %vm468_vm0, %v1591_v24, 0.0 }
 0x206   : > { %v1679_v13 = vsel %vm468_vm0, %v1589_v25, 0.0 }
 0x208   : > { %1680 = vadd.xlane.f32.xlu0 %v1679_v13 }
 0x209   : > { %1683 = vadd.xlane.f32.xlu1 %v1682_v26 }
 0x20c   : > { %1686 = vadd.xlane.f32.xlu0 %v1685_v12 }
 0x259   : > { %v1600_v9 = vpop.xlane.xlu0 %1599 }
 0x25a   : > { %v1692_v11 = vadd.f32 %v2666_v10, %v1600_v9 }
 0x25c   : > { %1725 = vst.msk [vmem:[%s2673_s18 + $0x10] sm:$0xff] %vm1722_vm7, %v1692_v11  ;;  %v1597_v27 = vpop.xlane.xlu1 %1596 }
 0x25d   : > { %v1691_v28 = vadd.f32 %v2666_v10, %v1597_v27  ;;  %v1594_v57 = vpop.xlane.xlu0 %1593 }
 0x25e   : > { %v1690_v29 = vadd.f32 %v2666_v10, %v1594_v57 }
 0x25f   : > { %1724 = vst.msk [vmem:[%s2673_s18 + $0x8] sm:$0xff] %vm1722_vm7, %v1691_v28 }
 0x260   : > { %1723 = vst.msk [vmem:[%s2673_s18] sm:$0xff] %vm1722_vm7, %v1690_v29 }
 0x261   : > { %v1612_v0 = vpop.xlane.xlu1 %1611  ;;  %v1603_v30 = vpop.xlane.xlu0 %1602 }
 0x262   : > { %v1696_v31 = vadd.f32 %v2666_v10, %v1612_v0  ;;  %v1693_v32 = vadd.f32 %v2666_v10, %v1603_v30 }
 0x264   : > { %1729 = vst.msk [vmem:[%s2673_s18 + $0x30] sm:$0xff] %vm1722_vm7, %v1696_v31  ;;  %1726 = vst.msk [vmem:[%s2673_s18 + $0x18] sm:$0xff] %vm1722_vm7, %v1693_v32 }
 0x265   : > { %v1606_v1 = vpop.xlane.xlu1 %1605  ;;  %v1615_v33 = vpop.xlane.xlu0 %1614 }
 0x266   : > { %v1694_v63 = vadd.f32 %v2666_v10, %v1606_v1  ;;  %v1697_v34 = vadd.f32 %v2666_v10, %v1615_v33 }
 0x268   : > { %1727 = vst.msk [vmem:[%s2673_s18 + $0x20] sm:$0xff] %vm1722_vm7, %v1694_v63  ;;  %1730 = vst.msk [vmem:[%s2673_s18 + $0x38] sm:$0xff] %vm1722_vm7, %v1697_v34 }
 0x269   : > { %v1624_v35 = vpop.xlane.xlu1 %1623  ;;  %v1609_v55 = vpop.xlane.xlu0 %1608 }
 0x26a   : > { %v1700_v36 = vadd.f32 %v2666_v10, %v1624_v35  ;;  %v1695_v53 = vadd.f32 %v2666_v10, %v1609_v55 }
 0x26c   : > { %1733 = vst.msk [vmem:[%s2673_s18 + $0x50] sm:$0xff] %vm1722_vm7, %v1700_v36  ;;  %1728 = vst.msk [vmem:[%s2673_s18 + $0x28] sm:$0xff] %vm1722_vm7, %v1695_v53 }
 0x26d   : > { %v1618_v38 = vpop.xlane.xlu1 %1617  ;;  %v1627_v39 = vpop.xlane.xlu0 %1626 }
 0x26e   : > { %v1698_v41 = vadd.f32 %v2666_v10, %v1618_v38  ;;  %v1701_v54 = vadd.f32 %v2666_v10, %v1627_v39 }
 0x270   : > { %1731 = vst.msk [vmem:[%s2673_s18 + $0x40] sm:$0xff] %vm1722_vm7, %v1698_v41  ;;  %1734 = vst.msk [vmem:[%s2673_s18 + $0x58] sm:$0xff] %vm1722_vm7, %v1701_v54 }
 0x271   : > { %v1636_v42 = vpop.xlane.xlu1 %1635  ;;  %v1621_v52 = vpop.xlane.xlu0 %1620 }
 0x272   : > { %v1704_v4 = vadd.f32 %v2666_v10, %v1636_v42  ;;  %v1699_v43 = vadd.f32 %v2666_v10, %v1621_v52 }
 0x274   : > { %1737 = vst.msk [vmem:[%s2673_s18 + $0x70] sm:$0xff] %vm1722_vm7, %v1704_v4  ;;  %1732 = vst.msk [vmem:[%s2673_s18 + $0x48] sm:$0xff] %vm1722_vm7, %v1699_v43 }
 0x275   : > { %v1630_v3 = vpop.xlane.xlu1 %1629  ;;  %v1639_v44 = vpop.xlane.xlu0 %1638 }
 0x276   : > { %v1702_v45 = vadd.f32 %v2666_v10, %v1630_v3  ;;  %v1705_v46 = vadd.f32 %v2666_v10, %v1639_v44 }
 0x278   : > { %1735 = vst.msk [vmem:[%s2673_s18 + $0x60] sm:$0xff] %vm1722_vm7, %v1702_v45  ;;  %1738 = vst.msk [vmem:[%s2673_s18 + $0x78] sm:$0xff] %vm1722_vm7, %v1705_v46 }
 0x279   : > { %v1648_v60 = vpop.xlane.xlu1 %1647  ;;  %v1633_v61 = vpop.xlane.xlu0 %1632 }
 0x27a   : > { %v1708_v2 = vadd.f32 %v2666_v10, %v1648_v60  ;;  %v1703_v40 = vadd.f32 %v2666_v10, %v1633_v61 }
 0x27c   : > { %1741 = vst.msk [vmem:[%s2673_s18 + $0x90] sm:$0xff] %vm1722_vm7, %v1708_v2  ;;  %1736 = vst.msk [vmem:[%s2673_s18 + $0x68] sm:$0xff] %vm1722_vm7, %v1703_v40 }
 0x27d   : > { %v1642_v47 = vpop.xlane.xlu1 %1641  ;;  %v1651_v48 = vpop.xlane.xlu0 %1650 }
 0x27e   : > { %v1706_v14 = vadd.f32 %v2666_v10, %v1642_v47  ;;  %v1709_v15 = vadd.f32 %v2666_v10, %v1651_v48 }
 0x280   : > { %1739 = vst.msk [vmem:[%s2673_s18 + $0x80] sm:$0xff] %vm1722_vm7, %v1706_v14  ;;  %1742 = vst.msk [vmem:[%s2673_s18 + $0x98] sm:$0xff] %vm1722_vm7, %v1709_v15 }
 0x281   : > { %v1660_v16 = vpop.xlane.xlu1 %1659  ;;  %v1645_v62 = vpop.xlane.xlu0 %1644 }
 0x282   : > { %v1712_v17 = vadd.f32 %v2666_v10, %v1660_v16  ;;  %v1707_v58 = vadd.f32 %v2666_v10, %v1645_v62 }
 0x284   : > { %1745 = vst.msk [vmem:[%s2673_s18 + $0xb0] sm:$0xff] %vm1722_vm7, %v1712_v17  ;;  %1740 = vst.msk [vmem:[%s2673_s18 + $0x88] sm:$0xff] %vm1722_vm7, %v1707_v58 }
 0x285   : > { %v1654_v18 = vpop.xlane.xlu1 %1653  ;;  %v1663_v19 = vpop.xlane.xlu0 %1662 }
 0x286   : > { %v1710_v8 = vadd.f32 %v2666_v10, %v1654_v18  ;;  %v1713_v51 = vadd.f32 %v2666_v10, %v1663_v19 }
 0x288   : > { %1743 = vst.msk [vmem:[%s2673_s18 + $0xa0] sm:$0xff] %vm1722_vm7, %v1710_v8  ;;  %1746 = vst.msk [vmem:[%s2673_s18 + $0xb8] sm:$0xff] %vm1722_vm7, %v1713_v51 }
 0x289   : > { %v1672_v6 = vpop.xlane.xlu1 %1671  ;;  %v1657_v59 = vpop.xlane.xlu0 %1656 }
 0x28a   : > { %v1716_v20 = vadd.f32 %v2666_v10, %v1672_v6  ;;  %v1711_v56 = vadd.f32 %v2666_v10, %v1657_v59 }
 0x28c   : > { %1749 = vst.msk [vmem:[%s2673_s18 + $0xd0] sm:$0xff] %vm1722_vm7, %v1716_v20  ;;  %1744 = vst.msk [vmem:[%s2673_s18 + $0xa8] sm:$0xff] %vm1722_vm7, %v1711_v56 }
 0x28d   : > { %v1666_v7 = vpop.xlane.xlu1 %1665  ;;  %v1675_v50 = vpop.xlane.xlu0 %1674 }
 0x28e   : > { %v1714_v5 = vadd.f32 %v2666_v10, %v1666_v7  ;;  %v1717_v21 = vadd.f32 %v2666_v10, %v1675_v50 }
 0x290   : > { %1747 = vst.msk [vmem:[%s2673_s18 + $0xc0] sm:$0xff] %vm1722_vm7, %v1714_v5  ;;  %1750 = vst.msk [vmem:[%s2673_s18 + $0xd8] sm:$0xff] %vm1722_vm7, %v1717_v21 }
 0x291   : > { %v1669_v22 = vpop.xlane.xlu0 %1668 }
 0x292   : > { %v1715_v23 = vadd.f32 %v2666_v10, %v1669_v22  ;;  %v1678_v37 = vpop.xlane.xlu1 %1677 }
 0x293   : > { %v1718_v24 = vadd.f32 %v2666_v10, %v1678_v37 }
 0x294   : > { %1748 = vst.msk [vmem:[%s2673_s18 + $0xc8] sm:$0xff] %vm1722_vm7, %v1715_v23 }
 0x295   : > { %1751 = vst.msk [vmem:[%s2673_s18 + $0xe0] sm:$0xff] %vm1722_vm7, %v1718_v24  ;;  %v1681_v49 = vpop.xlane.xlu0 %1680 }
 0x296   : > { %v1719_v25 = vadd.f32 %v2666_v10, %v1681_v49  ;;  %v1684_v13 = vpop.xlane.xlu1 %1683 }
 0x297   : > { %v1720_v26 = vadd.f32 %v2666_v10, %v1684_v13 }
 0x298   : > { %1752 = vst.msk [vmem:[%s2673_s18 + $0xe8] sm:$0xff] %vm1722_vm7, %v1719_v25 }
 0x299   : > { %1753 = vst.msk [vmem:[%s2673_s18 + $0xf0] sm:$0xff] %vm1722_vm7, %v1720_v26  ;;  %v1687_v12 = vpop.xlane.xlu0 %1686 }
 0x29a   : > { %v1721_v9 = vadd.f32 %v2666_v10, %v1687_v12 }
 0x29c   : > { %1754 = vst.msk [vmem:[%s2673_s18 + $0xf8] sm:$0xff] %vm1722_vm7, %v1721_v9 }
 0x29d PF: > { %s19_s29 = sadd.s32 1, %s2198_s29  }
 0x29e   : > { %p16_p4 = scmp.ge.s32.totalorder %s19_s29, 4  }
 0x2a0   :  { %18 = sbr.rel (!%p16_p4) target bundleno = 2 (0x2), region = 85 }

</bundles_post_ra>
